<compile_context>
chip_gen: v7x
topology: tpu7x:2x2x1
jax: 0.10.0
libtpu: 0.0.40
codegen_flags: <defaults>
</compile_context>

<pallas_src>
import functools

import jax
import jax.numpy as jnp
from jax.experimental import pallas as pl
from jax.experimental.pallas import tpu as pltpu


def _linear_kernel_acc(x_ref, w_ref, b_ref, o_ref, acc_ref):
    """General path: one (tm, tn) output tile, K reduced over grid axis 2."""
    k = pl.program_id(2)

    @pl.when(k == 0)
    def _():
        # Fuse the bias into the accumulator init; (1, tn) -> (tm, tn).
        acc_ref[...] = jnp.broadcast_to(
            b_ref[...].astype(jnp.float32), acc_ref.shape
        )

    acc_ref[...] += jnp.dot(
        x_ref[...], w_ref[...], preferred_element_type=jnp.float32
    )

    @pl.when(k == pl.num_programs(2) - 1)
    def _():
        o_ref[...] = acc_ref[...].astype(o_ref.dtype)


def _linear_kernel_single_k(x_ref, w_ref, b_ref, o_ref):
    """Fast path: whole K fits in one tile -> no scratch accumulator."""
    acc = jnp.dot(x_ref[...], w_ref[...], preferred_element_type=jnp.float32)
    o_ref[...] = (acc + b_ref[...].astype(jnp.float32)).astype(o_ref.dtype)


def _round_up(x, m):
    return ((x + m - 1) // m) * m


@functools.partial(jax.jit, static_argnames=("tm", "tn", "tk"))
def linear(x, weights, bias, *, tm=256, tn=256, tk=512):
    """Pallas equivalent of Linear.forward: x @ weights + bias.

    x:       (..., K)   leading batch dims are flattened into rows.
    weights: (K, N)
    bias:    (N,) or (1, N)
    """
    orig_shape = x.shape
    K = orig_shape[-1]
    Kw, N = weights.shape
    assert K == Kw, "input feature dim must match weights"

    x2 = x.reshape(-1, K)
    M = x2.shape[0]
    b2 = jnp.asarray(bias).reshape(1, -1)

    # Clamp tiles for small problems while keeping (8, 128) alignment.
    tm = min(tm, _round_up(M, 8))
    tn = min(tn, _round_up(N, 128))
    tk = min(tk, _round_up(K, 128))

    Mp, Kp, Np = _round_up(M, tm), _round_up(K, tk), _round_up(N, tn)

    # Zero padding is exact: padded-K contributes 0 to the dot product,
    # padded-M/N rows/cols are discarded below.
    if (Mp, Kp) != (M, K):
        x2 = jnp.pad(x2, ((0, Mp - M), (0, Kp - K)))
    wp = weights if (Kp, Np) == (K, N) else jnp.pad(
        weights, ((0, Kp - K), (0, Np - N))
    )
    bp = b2 if Np == N else jnp.pad(b2, ((0, 0), (0, Np - N)))

    flops = 2 * Mp * Np * Kp
    bytes_accessed = (
        Mp * Kp * x2.dtype.itemsize
        + Kp * Np * wp.dtype.itemsize
        + Np * bp.dtype.itemsize
        + Mp * Np * x.dtype.itemsize
    )
    cost = pl.CostEstimate(
        flops=flops, transcendentals=0, bytes_accessed=bytes_accessed
    )

    if Kp == tk:
        # Single-K fast path: 2-D grid, no scratch accumulator.
        out = pl.pallas_call(
            _linear_kernel_single_k,
            out_shape=jax.ShapeDtypeStruct((Mp, Np), x.dtype),
            grid_spec=pltpu.PrefetchScalarGridSpec(
                num_scalar_prefetch=0,
                grid=(Mp // tm, Np // tn),
                in_specs=[
                    pl.BlockSpec((tm, tk), lambda i, j: (i, 0)),   # x tile
                    pl.BlockSpec((tk, tn), lambda i, j: (0, j)),   # W tile
                    pl.BlockSpec((1, tn), lambda i, j: (0, j)),    # bias tile
                ],
                out_specs=pl.BlockSpec((tm, tn), lambda i, j: (i, j)),
            ),
            compiler_params=pltpu.CompilerParams(
                dimension_semantics=("parallel", "parallel"),
                vmem_limit_bytes=96 * 1024 * 1024,
            ),
            cost_estimate=cost,
        )(x2, wp, bp)
    else:
        out = pl.pallas_call(
            _linear_kernel_acc,
            out_shape=jax.ShapeDtypeStruct((Mp, Np), x.dtype),
            grid_spec=pltpu.PrefetchScalarGridSpec(
                num_scalar_prefetch=0,
                grid=(Mp // tm, Np // tn, Kp // tk),
                in_specs=[
                    pl.BlockSpec((tm, tk), lambda i, j, k: (i, k)),   # x tile
                    pl.BlockSpec((tk, tn), lambda i, j, k: (k, j)),   # W tile
                    pl.BlockSpec((1, tn), lambda i, j, k: (0, j)),    # bias
                ],
                out_specs=pl.BlockSpec((tm, tn), lambda i, j, k: (i, j)),
                scratch_shapes=[pltpu.VMEM((tm, tn), jnp.float32)],
            ),
            compiler_params=pltpu.CompilerParams(
                # Output rows/cols are independent -> shard across TensorCores
                # (v7x megacore); K is a reduction -> arbitrary.
                dimension_semantics=("parallel", "parallel", "arbitrary"),
                vmem_limit_bytes=96 * 1024 * 1024,
            ),
            cost_estimate=cost,
        )(x2, wp, bp)

    if (Mp, Np) != (M, N):
        out = out[:M, :N]
    return out.reshape(orig_shape[:-1] + (N,))


# TODO(synk): backward_update_gradient / backward_delta / update_parameters are
# training-time state mutation, not part of the forward pass, and are omitted.


if __name__ == "__main__":
    key = jax.random.PRNGKey(0)
    k1, k2, k3, k4 = jax.random.split(key, 4)

    # Small shapes consistent with the module: Linear(input=32, output=64)
    # applied to a batch of 16 rows.  Parameters are uniform [0, 1) like
    # np.random.rand in the reference.
    M, K, N = 16, 32, 64
    x = jax.random.normal(k1, (M, K), dtype=jnp.float32)
    weights = jax.random.uniform(k2, (K, N), dtype=jnp.float32)
    bias = jax.random.uniform(k3, (1, N), dtype=jnp.float32)

    y = linear(x, weights, bias)
    jax.block_until_ready(y)

    ref = x @ weights + bias
    assert y.shape == ref.shape and y.dtype == x.dtype
    assert jnp.allclose(y, ref, atol=1e-5, rtol=1e-5)

    # Also exercise the multi-K accumulator path with a larger, non-aligned
    # problem to make sure padding + reduction are correct.
    M2, K2, N2 = 200, 1000, 300
    x2 = jax.random.normal(k4, (M2, K2), dtype=jnp.float32)
    w2 = jax.random.uniform(k2, (K2, N2), dtype=jnp.float32)
    b2 = jax.random.uniform(k3, (1, N2), dtype=jnp.float32)
    y2 = linear(x2, w2, b2, tk=512)
    jax.block_until_ready(y2)
    ref2 = x2 @ w2 + b2
    assert jnp.allclose(y2, ref2, atol=1e-3, rtol=1e-4)

    print("KERNEL_OK")
</pallas_src>

<mosaic_0001>
module attributes {stable_mosaic.version = 11 : i64} {
  func.func @_linear_kernel_single_k(%arg0: i32, %arg1: i32, %arg2: memref<16x128xf32, #tpu.memory_space<vmem>>, %arg3: memref<128x128xf32, #tpu.memory_space<vmem>>, %arg4: memref<1x128xf32, #tpu.memory_space<vmem>>, %arg5: memref<16x128xf32, #tpu.memory_space<vmem>>) attributes {dimension_semantics = [#tpu.dimension_semantics<parallel>, #tpu.dimension_semantics<parallel>], iteration_bounds = array<i64: 1, 1>, scalar_prefetch = 0 : i64, scratch_operands = 0 : i64, tpu.core_type = #tpu.core_type<tc>, window_params = [{transform_indices = @transform_0, window_bounds = array<i64: 16, 128>}, {transform_indices = @transform_1, window_bounds = array<i64: 128, 128>}, {transform_indices = @transform_2, window_bounds = array<i64: 1, 128>}, {transform_indices = @transform_3, window_bounds = array<i64: 16, 128>}]} {
    %c0 = arith.constant 0 : index
    %c0_0 = arith.constant 0 : index
    %0 = vector.load %arg2[%c0, %c0_0] : memref<16x128xf32, #tpu.memory_space<vmem>>, vector<16x128xf32>
    %c0_1 = arith.constant 0 : index
    %c0_2 = arith.constant 0 : index
    %1 = vector.load %arg3[%c0_1, %c0_2] : memref<128x128xf32, #tpu.memory_space<vmem>>, vector<128x128xf32>
    %cst = arith.constant dense<0.000000e+00> : vector<16x128xf32>
    %2 = tpu.matmul %0, %1, %cst {dimension_numbers = #tpu.dot_dimension_numbers<[1], [0], [0], [1], [0, 0, 1, 1], [], []>} : vector<16x128xf32>, vector<128x128xf32>, vector<16x128xf32> -> vector<16x128xf32>
    %c0_3 = arith.constant 0 : index
    %c0_4 = arith.constant 0 : index
    %3 = vector.load %arg4[%c0_3, %c0_4] : memref<1x128xf32, #tpu.memory_space<vmem>>, vector<1x128xf32>
    %4 = vector.broadcast %3 : vector<1x128xf32> to vector<16x128xf32>
    %5 = arith.addf %2, %4 : vector<16x128xf32>
    %c0_5 = arith.constant 0 : index
    %c0_6 = arith.constant 0 : index
    %6 = vector.load %arg5[%c0_5, %c0_6] : memref<16x128xf32, #tpu.memory_space<vmem>>, vector<16x128xf32>
    tpu.vector_store %arg5[%c0_5, %c0_6], %5 {strides = array<i32>} : memref<16x128xf32, #tpu.memory_space<vmem>>, vector<16x128xf32>,
    return
  }
  func.func @transform_0(%arg0: i32, %arg1: i32) -> (i32, i32) {
    %c0_i32 = arith.constant 0 : i32
    %c0_i32_0 = arith.constant 0 : i32
    return %arg0, %c0_i32 : i32, i32
  }
  func.func @transform_1(%arg0: i32, %arg1: i32) -> (i32, i32) {
    %c0_i32 = arith.constant 0 : i32
    %c0_i32_0 = arith.constant 0 : i32
    return %c0_i32, %arg1 : i32, i32
  }
  func.func @transform_2(%arg0: i32, %arg1: i32) -> (i32, i32) {
    %c0_i32 = arith.constant 0 : i32
    %c0_i32_0 = arith.constant 0 : i32
    return %c0_i32, %arg1 : i32, i32
  }
  func.func @transform_3(%arg0: i32, %arg1: i32) -> (i32, i32) {
    %c0_i32 = arith.constant 0 : i32
    return %arg0, %arg1 : i32, i32
  }
}

</mosaic_0001>

<bundles_post_ra>
// kernel: linear.1
= control target key start
LH: loop header
LB: loop body
LE: loop exit
PB: predicated region body
PF: predicated region fallthrough
CT: control target
= control target key end

     0   :  { %8 = vsyncpa [#allocation3], 0  ;;  %s450_s0 = inlined_call_operand.hbm [shape: f32[16,128], index: 0, kind: input, shape index: {}]   ;;  %s451_s1 = inlined_call_operand.hbm [shape: f32[128,128], index: 1, kind: input, shape index: {}]   ;;  %s452_s2 = inlined_call_operand.hbm [shape: f32[1,128], index: 2, kind: input, shape index: {}]   ;;  %s453_s3 = inlined_call_operand.hbm [shape: f32[16,128], index: 3, kind: output, shape index: {}]  }
   0x1   :  { %9 = vsyncpa [#allocation6], 0 }
   0x2   :  { %10 = vsyncpa [#allocation4], 0  ;;  %s360_s12 = smov [#allocation5]   ;;  %s361_s14 = smov [#allocation2]  }
   0x3   :  { %s28_s13 = sshll.u32 %s360_s12, 4  ;;  %s16_s15 = sshll.u32 %s361_s14, 4  ;;  %s29_s13 = int_to_ptr.vmem [resolvable:$true] %s28_s13  ;;  %s386_s15 = int_to_ptr.vmem [resolvable:$true] %s16_s15 }
   0x4   :  { %s266_s18 = scalar_lea.hbm %s451_s1, 2048 }
   0x5   :  { %p267_p0 = scmp.ne.s32.totalorder %s451_s1, %s266_s18  ;;  %p270_p1 = scmp.lt.u32.totalorder %s266_s18, %s451_s1 }
   0x7   :  { %p272_p2 = pnand %p270_p1, %p267_p0 }
   0x9   :  { %275 = shalt.err (!%p272_p2)
}
   0xa   :  { %s276_s23 = scalar_lea.vmem %s29_s13, 2048  ;;  %p281_p4 = scmp.lt.s32.totalorder %s29_s13, %s29_s13 }
   0xb   :  { %p277_p3 = scmp.ne.s32.totalorder %s29_s13, %s276_s23  ;;  %p282_p5 = scmp.lt.s32.totalorder %s276_s23, %s276_s23 }
   0xd   :  { %p283_p6 = por %p282_p5, %p281_p4 }
   0xf   :  { %p284_p7 = pnand %p283_p6, %p277_p3 }
  0x11   :  { %287 = shalt.err (!%p284_p7)
}
  0x12   :  { %s362_s24 = smov 128   ;;  %s363_s25 = smov 8  }
  0x13   :  { %34 = dma.hbm_to_vmem [thread:$0]  %s451_s1, 2048, %s29_s13, [#allocation6], %s362_s24, %s362_s24, %s363_s25  }
  0x14   :  { %s288_s30 = scalar_lea.hbm %s450_s0, 256 }
  0x15   :  { %p289_p8 = scmp.ne.s32.totalorder %s450_s0, %s288_s30  ;;  %p292_p9 = scmp.lt.u32.totalorder %s288_s30, %s450_s0 }
  0x17   :  { %p294_p10 = pnand %p292_p9, %p289_p8 }
  0x19   :  { %297 = shalt.err (!%p294_p10)
}
  0x1a   :  { %s298_s8 = scalar_lea.vmem %s386_s15, 256  ;;  %p303_p12 = scmp.lt.s32.totalorder %s386_s15, %s386_s15 }
  0x1b   :  { %p299_p11 = scmp.ne.s32.totalorder %s386_s15, %s298_s8  ;;  %p304_p13 = scmp.lt.s32.totalorder %s298_s8, %s298_s8 }
  0x1d   :  { %p305_p0 = por %p304_p13, %p303_p12 }
  0x1f   :  { %p306_p1 = pnand %p305_p0, %p299_p11 }
  0x21   :  { %309 = shalt.err (!%p306_p1)
}
  0x22   :  { %22 = dma.hbm_to_vmem [thread:$0]  %s450_s0, 256, %s386_s15, [#allocation3], %s362_s24, %s362_s24, %s363_s25  }
  0x23   :  { %s364_s10 = smov [#allocation7]   ;;  %s310_s14 = scalar_lea.hbm %s452_s2, 16 }
  0x24   :  { %s41_s11 = sshll.u32 %s364_s10, 4  ;;  %p311_p2 = scmp.ne.s32.totalorder %s452_s2, %s310_s14  ;;  %s42_s11 = int_to_ptr.vmem [resolvable:$true] %s41_s11 }
  0x25   :  { %p314_p3 = scmp.lt.u32.totalorder %s310_s14, %s452_s2 }
  0x27   :  { %p316_p4 = pnand %p314_p3, %p311_p2 }
  0x29   :  { %319 = shalt.err (!%p316_p4)
}
  0x2a   :  { %s320_s20 = scalar_lea.vmem %s42_s11, 16  ;;  %s324_s0 = scalar_lea.vmem %s42_s11, 32 }
  0x2b   :  { %p321_p5 = scmp.ne.s32.totalorder %s42_s11, %s320_s20  ;;  %p325_p6 = scmp.lt.s32.totalorder %s42_s11, %s42_s11 }
  0x2c   :  { %p326_p7 = scmp.lt.s32.totalorder %s324_s0, %s320_s20 }
  0x2e   :  { %p327_p8 = por %p326_p7, %p325_p6 }
  0x30   :  { %p328_p9 = pnand %p327_p8, %p321_p5 }
  0x32   :  { %331 = shalt.err (!%p328_p9)
}
  0x33   :  { %44 = dma.hbm_to_vmem [thread:$0]  %s452_s2, 16, %s42_s11, [#allocation6]  }
  0x34   :  { %354 = dma.done.wait [#allocation3], 256  }
  0x35   :  { %355 = vsyncadd [#allocation3], 4294967040 }
  0x36   :  { %356 = dma.done.wait [#allocation6], 2064  }
  0x37   :  { %357 = vsyncadd [#allocation6], 4294965232  ;;  %v56_v0 = vld [vmem:[#allocation5] sm:$0xff]  ;;  %v57_v1 = vld [vmem:[#allocation5 + $0x8] sm:$0xff]  ;;  %s365_s2 = smov [#allocation8]  }
  0x38   :  { %v58_v2 = vld [vmem:[#allocation5 + $0x10] sm:$0xff]  ;;  %v228_v3 = vpack.c.bf16 %v57_v1, %v56_v0  ;;  %v59_v4 = vld [vmem:[#allocation5 + $0x18] sm:$0xff]  ;;  %v60_v6 = vld [vmem:[#allocation5 + $0x20] sm:$0xff]  ;;  %s161_s22 = sshll.u32 %s365_s2, 4  ;;  %s162_s22 = int_to_ptr.vmem [resolvable:$true] %s161_s22 }
  0x39   :  { %v232_v5 = vpack.c.bf16 %v59_v4, %v58_v2  ;;  %v61_v7 = vld [vmem:[#allocation5 + $0x28] sm:$0xff]  ;;  %v54_v9 = vld [vmem:[#allocation2] sm:$0xff]  ;;  %v63_v11 = vld [vmem:[#allocation5 + $0x38] sm:$0xff]  ;;  %s332_s23 = scalar_lea.vmem %s162_s22, 256  ;;  %p337_p11 = scmp.lt.s32.totalorder %s162_s22, %s162_s22 }
  0x3a   :  { %229 = vmatprep.subr.bf16.mxu0 %v228_v3  ;;  %v236_v8 = vpack.c.bf16 %v61_v7, %v60_v6  ;;  %v62_v10 = vld [vmem:[#allocation5 + $0x30] sm:$0xff]  ;;  %225 = vmatprep.mubr.f32.mxu0 %v54_v9  ;;  %v64_v13 = vld [vmem:[#allocation5 + $0x40] sm:$0xff]  ;;  %v65_v14 = vld [vmem:[#allocation5 + $0x48] sm:$0xff]  ;;  %p333_p10 = scmp.ne.s32.totalorder %s162_s22, %s332_s23  ;;  %p338_p12 = scmp.lt.s32.totalorder %s332_s23, %s332_s23 }
  0x3b   :  { %231 = vmatpush3.bf16.msra.mxu0 %v228_v3  ;;  %v240_v12 = vpack.c.bf16 %v63_v11, %v62_v10  ;;  %v244_v15 = vpack.c.bf16 %v65_v14, %v64_v13  ;;  %v66_v16 = vld [vmem:[#allocation5 + $0x50] sm:$0xff]  ;;  %v67_v17 = vld [vmem:[#allocation5 + $0x58] sm:$0xff]  ;;  %v68_v19 = vld [vmem:[#allocation5 + $0x60] sm:$0xff] }
  0x3c   :  { %233 = vmatprep.subr.bf16.mxu0 %v232_v5  ;;  %v248_v18 = vpack.c.bf16 %v67_v17, %v66_v16  ;;  %v69_v20 = vld [vmem:[#allocation5 + $0x68] sm:$0xff]  ;;  %v70_v22 = vld [vmem:[#allocation5 + $0x70] sm:$0xff]  ;;  %v71_v23 = vld [vmem:[#allocation5 + $0x78] sm:$0xff]  ;;  %p339_p13 = por %p338_p12, %p337_p11 }
  0x3d   :  { %v252_v21 = vpack.c.bf16 %v69_v20, %v68_v19  ;;  %v256_v24 = vpack.c.bf16 %v71_v23, %v70_v22  ;;  %v55_v25 = vld [vmem:[#allocation2 + $0x8] sm:$0xff]  ;;  %v174_v26 = vld [vmem:[#allocation7] ss:$0 sm:$0xff] }
  0x3e   :  { %p340_p0 = pnand %p339_p13, %p333_p10 }
  0x3f   :  { %235 = vmatpush3.bf16.msra.mxu0 %v232_v5 }
  0x40   :  { %237 = vmatprep.subr.bf16.mxu0 %v236_v8 }
  0x43   :  { %239 = vmatpush3.bf16.msra.mxu0 %v236_v8 }
  0x44   :  { %241 = vmatprep.subr.bf16.mxu0 %v240_v12 }
  0x47   :  { %243 = vmatpush3.bf16.msra.mxu0 %v240_v12 }
  0x48   :  { %245 = vmatprep.subr.bf16.mxu0 %v244_v15 }
  0x4b   :  { %247 = vmatpush3.bf16.msra.mxu0 %v244_v15 }
  0x4c   :  { %249 = vmatprep.subr.bf16.mxu0 %v248_v18 }
  0x4f   :  { %251 = vmatpush3.bf16.msra.mxu0 %v248_v18 }
  0x50   :  { %253 = vmatprep.subr.bf16.mxu0 %v252_v21 }
  0x53   :  { %255 = vmatpush3.bf16.msra.mxu0 %v252_v21 }
  0x54   :  { %257 = vmatprep.subr.bf16.mxu0 %v256_v24 }
  0x57   :  { %259 = vmatpush3.bf16.msra.mxu0 %v256_v24 }
  0x5a   :  { %226 = vmatmul.mubr.f32.vlgmr.msra.gmra.mrb[0].mxu0 %v55_v25 }
 0x12d   :  { %v227_v27 = vpop.f32.mrb[0].mxu0 }
 0x12e   :  { %v151_v28 = vadd.f32 %v227_v27, %v174_v26  ;;  %v145_v29 = vpop.f32.mrb[1].mxu0 }
 0x12f   :  { %v146_v30 = vadd.f32 %v174_v26, %v145_v29 }
 0x130   :  { %155 = vst [vmem:[#allocation8 + $0x8] sm:$0xff] %v151_v28 }
 0x131   :  { %154 = vst [vmem:[#allocation8] sm:$0xff] %v146_v30 }
 0x132   :  { %343 = shalt.err (!%p340_p0)
}
 0x133   :  { %s344_s28 = scalar_lea.hbm %s453_s3, 256 }
 0x134   :  { %p345_p1 = scmp.ne.s32.totalorder %s453_s3, %s344_s28  ;;  %p348_p2 = scmp.lt.u32.totalorder %s344_s28, %s453_s3 }
 0x136   :  { %p350_p3 = pnand %p348_p2, %p345_p1 }
 0x138   :  { %353 = shalt.err (!%p350_p3)
}
 0x139   :  { %167 = dma.vmem_to_hbm [thread:$0]  %s162_s22, 256, %s453_s3, [#allocation4], %s362_s24, %s362_s24, %s363_s25  }
 0x13a   :  { %358 = dma.done.wait [#allocation4], 256  }
 0x13b   :  { %359 = vsyncadd [#allocation4], 4294967040 }
 0x13c   :  { %171 = vsyncpa [#allocation3], 1 }
 0x13d   :  { %172 = vsyncpa [#allocation6], 1 }
 0x13e   :  { %173 = vsyncpa [#allocation4], 1 }

</bundles_post_ra>
